<compile_context>
chip_gen: v6e
topology: v6e:2x2x1
jax: 0.10.0
libtpu: 0.0.40
codegen_flags: <defaults>
</compile_context>

<pallas_src>
import jax
import jax.numpy as jnp
from jax.experimental import pallas as pl
from jax.experimental.pallas import tpu as pltpu

_BN_EPS = 1e-5


# ------------------------------ fused kernel -------------------------------
def _mlp_kernel(x_ref, w1_ref, w2_ref, w3_ref, w4_ref,
                b1_ref, b2_ref, b3_ref, b4_ref, o_ref):
    """One batch tile of the full FullyConnectedPart forward.

    x_ref : (TB, F_in)   bf16 activations (one batch tile)
    wK_ref: (in, out)    bf16 weights; BN folded in, w3/w4 padded to 128 cols
    bK_ref: (1, out)     f32 biases (BN shift folded in, padded where needed)
    o_ref : (TB, 128)    f32 lane-dense output tile; real result is column 0
    """
    # Layer 1: Linear(F_in, 512) + ReLU              [BN1 folded into layer 2]
    h = jnp.dot(x_ref[...], w1_ref[...], preferred_element_type=jnp.float32)
    h = jnp.maximum(h + b1_ref[...], 0.0)
    # Layer 2: Linear(512, 128) + ReLU               [BN2 folded into layer 3]
    h = jnp.dot(h.astype(jnp.bfloat16), w2_ref[...],
                preferred_element_type=jnp.float32)
    h = jnp.maximum(h + b2_ref[...], 0.0)
    # Layer 3: Linear(128, 64->128 padded) + ReLU
    h = jnp.dot(h.astype(jnp.bfloat16), w3_ref[...],
                preferred_element_type=jnp.float32)
    h = jnp.maximum(h + b3_ref[...], 0.0)
    # Layer 4: Linear(64, 1), padded to (128, 128) -> lane-dense store
    o = jnp.dot(h.astype(jnp.bfloat16), w4_ref[...],
                preferred_element_type=jnp.float32)
    o_ref[...] = o + b4_ref[...]


# --------------------------------- wrapper ----------------------------------
def _round_up(n, m):
    return ((n + m - 1) // m) * m


def fully_connected_forward(x, params, *, tile_b=512):
    """x: (B, in_features) f32 -> (B, 1) f32 (eval-mode forward)."""
    (w1, b1), bn1, (w2, b2), bn2, (w3, b3), (w4, b4) = params
    g1, be1, m1, v1 = bn1
    g2, be2, m2, v2 = bn2

    def fold_bn(gamma, beta, mean, var):
        scale = gamma * jax.lax.rsqrt(var + _BN_EPS)
        shift = beta - mean * scale
        return scale.astype(jnp.float32), shift.astype(jnp.float32)

    s1, t1 = fold_bn(g1, be1, m1, v1)
    s2, t2 = fold_bn(g2, be2, m2, v2)

    b, f_in = x.shape
    # Batch tile: multiple of 16 (bf16 sublanes); pad batch to a tile multiple.
    tb = _round_up(min(int(tile_b), _round_up(b, 16)), 16)
    bp = _round_up(b, tb)
    xp = jnp.pad(x, ((0, bp - b), (0, 0))).astype(jnp.bfloat16)

    # PyTorch Linear weights are (out, in) -> transpose to (in, out) for x @ W.
    # Eval-mode BN sits between ReLU and the next Linear, so it folds exactly
    # into that Linear (done in f32 BEFORE the bf16 cast):
    #   (h*s + t) @ Wt  ==  h @ (s[:, None] * Wt) + t @ Wt
    w1t = w1.T.astype(jnp.float32)
    w2f = s1[:, None] * w2.T.astype(jnp.float32)
    b2f = b2.astype(jnp.float32) + t1 @ w2.T.astype(jnp.float32)
    w3f = s2[:, None] * w3.T.astype(jnp.float32)
    b3f = b3.astype(jnp.float32) + t2 @ w3.T.astype(jnp.float32)
    w4t = w4.T.astype(jnp.float32)

    # Lane-dense zero padding: layer 3 -> 128 output columns, layer 4 -> (128,128).
    w3p = jnp.pad(w3f, ((0, 0), (0, 128 - w3f.shape[1])))
    b3p = jnp.pad(b3f.reshape(1, -1), ((0, 0), (0, 128 - b3f.shape[0])))
    w4p = jnp.pad(w4t, ((0, 128 - w4t.shape[0]), (0, 128 - w4t.shape[1])))
    b4p = jnp.pad(b4.reshape(1, -1).astype(jnp.float32),
                  ((0, 0), (0, 128 - b4.shape[0])))

    args = (
        xp,
        w1t.astype(jnp.bfloat16), w2f.astype(jnp.bfloat16),
        w3p.astype(jnp.bfloat16), w4p.astype(jnp.bfloat16),
        b1.reshape(1, -1).astype(jnp.float32),
        b2f.reshape(1, -1), b3p, b4p,
    )

    const = lambda i: (0, 0)                      # weights/biases: resident
    in_specs = [
        pl.BlockSpec((tb, f_in), lambda i: (i, 0)),   # x: pipelined over batch
        pl.BlockSpec((f_in, 512), const),
        pl.BlockSpec((512, 128), const),
        pl.BlockSpec((128, 128), const),
        pl.BlockSpec((128, 128), const),
        pl.BlockSpec((1, 512), const),
        pl.BlockSpec((1, 128), const),
        pl.BlockSpec((1, 128), const),
        pl.BlockSpec((1, 128), const),
    ]

    flops = 2 * bp * (f_in * 512 + 512 * 128 + 128 * 128 + 128 * 128)
    bytes_accessed = (bp * f_in * 2 + bp * 128 * 4
                      + (f_in * 512 + 512 * 128 + 2 * 128 * 128) * 2)

    out = pl.pallas_call(
        _mlp_kernel,
        grid=(bp // tb,),
        in_specs=in_specs,
        out_specs=pl.BlockSpec((tb, 128), lambda i: (i, 0)),
        out_shape=jax.ShapeDtypeStruct((bp, 128), jnp.float32),
        compiler_params=pltpu.CompilerParams(
            dimension_semantics=("parallel",)),      # v7x megacore; no-op v5e/v6e
        cost_estimate=pl.CostEstimate(
            flops=flops, transcendentals=0, bytes_accessed=bytes_accessed),
    )(*args)
    return out[:b, :1]


# ------------------------------ param init ----------------------------------
def init_params(key, in_features):
    def linear(k, fan_in, fan_out):
        kw, kb = jax.random.split(k)
        bound = 1.0 / float(fan_in) ** 0.5
        w = jax.random.uniform(kw, (fan_out, fan_in), jnp.float32, -bound, bound)
        bb = jax.random.uniform(kb, (fan_out,), jnp.float32, -bound, bound)
        return w, bb

    def batchnorm(k, feat):
        kg, kb, km, kv = jax.random.split(k, 4)
        gamma = 1.0 + 0.1 * jax.random.normal(kg, (feat,), jnp.float32)
        beta = 0.1 * jax.random.normal(kb, (feat,), jnp.float32)
        mean = 0.1 * jax.random.normal(km, (feat,), jnp.float32)
        var = jax.random.uniform(kv, (feat,), jnp.float32, 0.5, 1.5)
        return gamma, beta, mean, var

    k1, k2, k3, k4, k5, k6 = jax.random.split(key, 6)
    return [linear(k1, in_features, 512), batchnorm(k2, 512),
            linear(k3, 512, 128), batchnorm(k4, 128),
            linear(k5, 128, 64), linear(k6, 64, 1)]


# ------------------------- pure-JAX reference check -------------------------
def _ref_forward(x, params):
    """f32 PyTorch-exact eval-mode forward (Dropout = identity)."""
    (w1, b1), (g1, be1, m1, v1), (w2, b2), (g2, be2, m2, v2), \
        (w3, b3), (w4, b4) = params

    def bn(h, gamma, beta, mean, var):
        return (h - mean) * jax.lax.rsqrt(var + _BN_EPS) * gamma + beta

    h = jnp.maximum(x @ w1.T + b1, 0.0)
    h = bn(h, g1, be1, m1, v1)
    h = jnp.maximum(h @ w2.T + b2, 0.0)
    h = bn(h, g2, be2, m2, v2)
    h = jnp.maximum(h @ w3.T + b3, 0.0)
    return h @ w4.T + b4


if __name__ == "__main__":
    key = jax.random.PRNGKey(0)
    kp, kx = jax.random.split(key)
    in_features = 512            # 128 * 2 * 2 features from the CNN front end
    batch = 8
    params = init_params(kp, in_features)
    x = jax.random.normal(kx, (batch, in_features), jnp.float32)

    out = jax.block_until_ready(fully_connected_forward(x, params))
    assert out.shape == (batch, 1), out.shape

    ref = jax.block_until_ready(_ref_forward(x, params))
    rel = float(jnp.max(jnp.abs(out - ref)) / (jnp.max(jnp.abs(ref)) + 1e-6))
    assert rel < 3e-2, f"max relative error {rel}"   # bf16 MXU vs f32 reference

    print("KERNEL_OK")
</pallas_src>

<mosaic_0001>
module attributes {stable_mosaic.version = 11 : i64} {
  func.func @_mlp_kernel(%arg0: i32, %arg1: memref<16x512xbf16, #tpu.memory_space<vmem>>, %arg2: memref<512x512xbf16, #tpu.memory_space<vmem>>, %arg3: memref<512x128xbf16, #tpu.memory_space<vmem>>, %arg4: memref<128x128xbf16, #tpu.memory_space<vmem>>, %arg5: memref<128x128xbf16, #tpu.memory_space<vmem>>, %arg6: memref<1x512xf32, #tpu.memory_space<vmem>>, %arg7: memref<1x128xf32, #tpu.memory_space<vmem>>, %arg8: memref<1x128xf32, #tpu.memory_space<vmem>>, %arg9: memref<1x128xf32, #tpu.memory_space<vmem>>, %arg10: memref<16x128xf32, #tpu.memory_space<vmem>>) attributes {dimension_semantics = [#tpu.dimension_semantics<parallel>], iteration_bounds = array<i64: 1>, scalar_prefetch = 0 : i64, scratch_operands = 0 : i64, tpu.core_type = #tpu.core_type<tc>, window_params = [{transform_indices = @transform_0, window_bounds = array<i64: 16, 512>}, {pipeline_mode = #tpu.pipeline_mode<synchronous>, transform_indices = @transform_1, window_bounds = array<i64: 512, 512>}, {pipeline_mode = #tpu.pipeline_mode<synchronous>, transform_indices = @transform_2, window_bounds = array<i64: 512, 128>}, {pipeline_mode = #tpu.pipeline_mode<synchronous>, transform_indices = @transform_3, window_bounds = array<i64: 128, 128>}, {pipeline_mode = #tpu.pipeline_mode<synchronous>, transform_indices = @transform_4, window_bounds = array<i64: 128, 128>}, {pipeline_mode = #tpu.pipeline_mode<synchronous>, transform_indices = @transform_5, window_bounds = array<i64: 1, 512>}, {pipeline_mode = #tpu.pipeline_mode<synchronous>, transform_indices = @transform_6, window_bounds = array<i64: 1, 128>}, {pipeline_mode = #tpu.pipeline_mode<synchronous>, transform_indices = @transform_7, window_bounds = array<i64: 1, 128>}, {pipeline_mode = #tpu.pipeline_mode<synchronous>, transform_indices = @transform_8, window_bounds = array<i64: 1, 128>}, {transform_indices = @transform_9, window_bounds = array<i64: 16, 128>}]} {
    %c0 = arith.constant 0 : index
    %c0_0 = arith.constant 0 : index
    %0 = vector.load %arg1[%c0, %c0_0] : memref<16x512xbf16, #tpu.memory_space<vmem>>, vector<16x512xbf16>
    %c0_1 = arith.constant 0 : index
    %c0_2 = arith.constant 0 : index
    %1 = vector.load %arg2[%c0_1, %c0_2] : memref<512x512xbf16, #tpu.memory_space<vmem>>, vector<512x512xbf16>
    %cst = arith.constant dense<0.000000e+00> : vector<16x512xf32>
    %2 = tpu.matmul %0, %1, %cst {dimension_numbers = #tpu.dot_dimension_numbers<[1], [0], [0], [1], [0, 0, 1, 1], [], []>} : vector<16x512xbf16>, vector<512x512xbf16>, vector<16x512xf32> -> vector<16x512xf32>
    %c0_3 = arith.constant 0 : index
    %c0_4 = arith.constant 0 : index
    %3 = vector.load %arg6[%c0_3, %c0_4] : memref<1x512xf32, #tpu.memory_space<vmem>>, vector<1x512xf32>
    %4 = vector.broadcast %3 : vector<1x512xf32> to vector<16x512xf32>
    %5 = arith.addf %2, %4 : vector<16x512xf32>
    %cst_5 = arith.constant 0.000000e+00 : f32
    %6 = vector.broadcast %cst_5 : f32 to vector<16x512xf32>
    %7 = arith.maximumf %5, %6 : vector<16x512xf32>
    %8 = arith.truncf %7 : vector<16x512xf32> to vector<16x512xbf16>
    %c0_6 = arith.constant 0 : index
    %c0_7 = arith.constant 0 : index
    %9 = vector.load %arg3[%c0_6, %c0_7] : memref<512x128xbf16, #tpu.memory_space<vmem>>, vector<512x128xbf16>
    %cst_8 = arith.constant dense<0.000000e+00> : vector<16x128xf32>
    %10 = tpu.matmul %8, %9, %cst_8 {dimension_numbers = #tpu.dot_dimension_numbers<[1], [0], [0], [1], [0, 0, 1, 1], [], []>} : vector<16x512xbf16>, vector<512x128xbf16>, vector<16x128xf32> -> vector<16x128xf32>
    %c0_9 = arith.constant 0 : index
    %c0_10 = arith.constant 0 : index
    %11 = vector.load %arg7[%c0_9, %c0_10] : memref<1x128xf32, #tpu.memory_space<vmem>>, vector<1x128xf32>
    %12 = vector.broadcast %11 : vector<1x128xf32> to vector<16x128xf32>
    %13 = arith.addf %10, %12 : vector<16x128xf32>
    %cst_11 = arith.constant 0.000000e+00 : f32
    %14 = vector.broadcast %cst_11 : f32 to vector<16x128xf32>
    %15 = arith.maximumf %13, %14 : vector<16x128xf32>
    %16 = arith.truncf %15 : vector<16x128xf32> to vector<16x128xbf16>
    %c0_12 = arith.constant 0 : index
    %c0_13 = arith.constant 0 : index
    %17 = vector.load %arg4[%c0_12, %c0_13] : memref<128x128xbf16, #tpu.memory_space<vmem>>, vector<128x128xbf16>
    %cst_14 = arith.constant dense<0.000000e+00> : vector<16x128xf32>
    %18 = tpu.matmul %16, %17, %cst_14 {dimension_numbers = #tpu.dot_dimension_numbers<[1], [0], [0], [1], [0, 0, 1, 1], [], []>} : vector<16x128xbf16>, vector<128x128xbf16>, vector<16x128xf32> -> vector<16x128xf32>
    %c0_15 = arith.constant 0 : index
    %c0_16 = arith.constant 0 : index
    %19 = vector.load %arg8[%c0_15, %c0_16] : memref<1x128xf32, #tpu.memory_space<vmem>>, vector<1x128xf32>
    %20 = vector.broadcast %19 : vector<1x128xf32> to vector<16x128xf32>
    %21 = arith.addf %18, %20 : vector<16x128xf32>
    %cst_17 = arith.constant 0.000000e+00 : f32
    %22 = vector.broadcast %cst_17 : f32 to vector<16x128xf32>
    %23 = arith.maximumf %21, %22 : vector<16x128xf32>
    %24 = arith.truncf %23 : vector<16x128xf32> to vector<16x128xbf16>
    %c0_18 = arith.constant 0 : index
    %c0_19 = arith.constant 0 : index
    %25 = vector.load %arg5[%c0_18, %c0_19] : memref<128x128xbf16, #tpu.memory_space<vmem>>, vector<128x128xbf16>
    %cst_20 = arith.constant dense<0.000000e+00> : vector<16x128xf32>
    %26 = tpu.matmul %24, %25, %cst_20 {dimension_numbers = #tpu.dot_dimension_numbers<[1], [0], [0], [1], [0, 0, 1, 1], [], []>} : vector<16x128xbf16>, vector<128x128xbf16>, vector<16x128xf32> -> vector<16x128xf32>
    %c0_21 = arith.constant 0 : index
    %c0_22 = arith.constant 0 : index
    %27 = vector.load %arg9[%c0_21, %c0_22] : memref<1x128xf32, #tpu.memory_space<vmem>>, vector<1x128xf32>
    %28 = vector.broadcast %27 : vector<1x128xf32> to vector<16x128xf32>
    %29 = arith.addf %26, %28 : vector<16x128xf32>
    %c0_23 = arith.constant 0 : index
    %c0_24 = arith.constant 0 : index
    %30 = vector.load %arg10[%c0_23, %c0_24] : memref<16x128xf32, #tpu.memory_space<vmem>>, vector<16x128xf32>
    tpu.vector_store %arg10[%c0_23, %c0_24], %29 {strides = array<i32>} : memref<16x128xf32, #tpu.memory_space<vmem>>, vector<16x128xf32>,
    return
  }
  func.func @transform_0(%arg0: i32) -> (i32, i32) {
    %c0_i32 = arith.constant 0 : i32
    %c0_i32_0 = arith.constant 0 : i32
    return %arg0, %c0_i32 : i32, i32
  }
  func.func @transform_1(%arg0: i32) -> (i32, i32) {
    %c0_i32 = arith.constant 0 : i32
    %c0_i32_0 = arith.constant 0 : i32
    %c0_i32_1 = arith.constant 0 : i32
    return %c0_i32, %c0_i32_0 : i32, i32
  }
  func.func @transform_2(%arg0: i32) -> (i32, i32) {
    %c0_i32 = arith.constant 0 : i32
    %c0_i32_0 = arith.constant 0 : i32
    %c0_i32_1 = arith.constant 0 : i32
    return %c0_i32, %c0_i32_0 : i32, i32
  }
  func.func @transform_3(%arg0: i32) -> (i32, i32) {
    %c0_i32 = arith.constant 0 : i32
    %c0_i32_0 = arith.constant 0 : i32
    %c0_i32_1 = arith.constant 0 : i32
    return %c0_i32, %c0_i32_0 : i32, i32
  }
  func.func @transform_4(%arg0: i32) -> (i32, i32) {
    %c0_i32 = arith.constant 0 : i32
    %c0_i32_0 = arith.constant 0 : i32
    %c0_i32_1 = arith.constant 0 : i32
    return %c0_i32, %c0_i32_0 : i32, i32
  }
  func.func @transform_5(%arg0: i32) -> (i32, i32) {
    %c0_i32 = arith.constant 0 : i32
    %c0_i32_0 = arith.constant 0 : i32
    %c0_i32_1 = arith.constant 0 : i32
    return %c0_i32, %c0_i32_0 : i32, i32
  }
  func.func @transform_6(%arg0: i32) -> (i32, i32) {
    %c0_i32 = arith.constant 0 : i32
    %c0_i32_0 = arith.constant 0 : i32
    %c0_i32_1 = arith.constant 0 : i32
    return %c0_i32, %c0_i32_0 : i32, i32
  }
  func.func @transform_7(%arg0: i32) -> (i32, i32) {
    %c0_i32 = arith.constant 0 : i32
    %c0_i32_0 = arith.constant 0 : i32
    %c0_i32_1 = arith.constant 0 : i32
    return %c0_i32, %c0_i32_0 : i32, i32
  }
  func.func @transform_8(%arg0: i32) -> (i32, i32) {
    %c0_i32 = arith.constant 0 : i32
    %c0_i32_0 = arith.constant 0 : i32
    %c0_i32_1 = arith.constant 0 : i32
    return %c0_i32, %c0_i32_0 : i32, i32
  }
  func.func @transform_9(%arg0: i32) -> (i32, i32) {
    %c0_i32 = arith.constant 0 : i32
    %c0_i32_0 = arith.constant 0 : i32
    return %arg0, %c0_i32 : i32, i32
  }
}

</mosaic_0001>

<bundles_post_ra>
// kernel: tpu_custom_call.1
= control target key start
LH: loop header
LB: loop body
LE: loop exit
PB: predicated region body
PF: predicated region fallthrough
CT: control target
= control target key end

     0   :  { %14 = vsyncpa [#allocation3], 0  ;;  %s2498_s0 = inlined_call_operand.hbm [shape: bf16[16,512], index: 0, kind: input, shape index: {}]   ;;  %s2499_s1 = inlined_call_operand.hbm [shape: bf16[512,512], index: 1, kind: input, shape index: {}]   ;;  %s2500_s2 = inlined_call_operand.hbm [shape: bf16[512,128], index: 2, kind: input, shape index: {}]   ;;  %s2501_s3 = inlined_call_operand.hbm [shape: bf16[128,128], index: 3, kind: input, shape index: {}]   ;;  %s2502_s4 = inlined_call_operand.hbm [shape: bf16[128,128], index: 4, kind: input, shape index: {}]   ;;  %s2503_s5 = inlined_call_operand.vmem [shape: f32[1,512], index: 5, kind: input, shape index: {}]   ;;  %s2504_s6 = inlined_call_operand.vmem [shape: f32[1,128], index: 6, kind: input, shape index: {}]   ;;  %s2505_s7 = inlined_call_operand.vmem [shape: f32[1,128], index: 7, kind: input, shape index: {}]   ;;  %s2506_s8 = inlined_call_operand.vmem [shape: f32[1,128], index: 8, kind: input, shape index: {}]   ;;  %s2507_s9 = inlined_call_operand.hbm [shape: f32[16,128], index: 9, kind: output, shape index: {}]  }
   0x1   :  { %15 = vsyncpa [#allocation6], 0 }
   0x2   :  { %16 = vsyncpa [#allocation9], 0 }
   0x3   :  { %17 = vsyncpa [#allocation4], 0  ;;  %s2369_s30 = smov [#allocation5]  }
   0x4   :  { %s35_s10 = sshll.u32 %s2369_s30, 4  ;;  %s36_s10 = int_to_ptr.vmem [resolvable:$true] %s35_s10 }
   0x5   :  { %s2249_s11 = scalar_lea.vmem %s36_s10, 16384  ;;  %p2254_p1 = scmp.lt.s32.totalorder %s36_s10, %s36_s10 }
   0x6   :  { %p2250_p0 = scmp.ne.s32.totalorder %s36_s10, %s2249_s11  ;;  %p2255_p2 = scmp.lt.s32.totalorder %s2249_s11, %s2249_s11 }
   0x8   :  { %p2256_p3 = por %p2255_p2, %p2254_p1 }
   0xa   :  { %p2257_p4 = pnand %p2256_p3, %p2250_p0 }
   0xc   :  { %2260 = shalt.err (!%p2257_p4)
}
   0xd   :  { %s2370_s12 = smov 256   ;;  %s2371_s13 = smov 16  }
   0xe   :  { %41 = dma.hbm_to_vmem [thread:$0]  %s2499_s1, 16384, %s36_s10, [#allocation6], %s2370_s12, %s2370_s12, %s2371_s13  }
   0xf   :  { %s2372_s16 = smov [#allocation8]   ;;  %s2373_s18 = smov [#allocation2]  }
  0x10   :  { %s59_s17 = sshll.u32 %s2372_s16, 4  ;;  %s23_s19 = sshll.u32 %s2373_s18, 4  ;;  %s60_s17 = int_to_ptr.vmem [resolvable:$true] %s59_s17  ;;  %s24_s19 = int_to_ptr.vmem [resolvable:$true] %s23_s19 }
  0x11   :  { %s2269_s20 = scalar_lea.vmem %s60_s17, 1024  ;;  %p2274_p6 = scmp.lt.s32.totalorder %s60_s17, %s60_s17 }
  0x12   :  { %p2270_p5 = scmp.ne.s32.totalorder %s60_s17, %s2269_s20  ;;  %p2275_p7 = scmp.lt.s32.totalorder %s2269_s20, %s2269_s20 }
  0x14   :  { %p2276_p8 = por %p2275_p7, %p2274_p6 }
  0x16   :  { %p2277_p9 = pnand %p2276_p8, %p2270_p5 }
  0x18   :  { %2280 = shalt.err (!%p2277_p9)
}
  0x19   :  { %s2374_s21 = smov 64   ;;  %s2375_s22 = smov 4  }
  0x1a   :  { %65 = dma.hbm_to_vmem [thread:$0]  %s2501_s3, 1024, %s60_s17, [#allocation9], %s2374_s21, %s2374_s21, %s2375_s22  }
  0x1b   :  { %s2289_s1 = scalar_lea.vmem %s24_s19, 512  ;;  %p2294_p11 = scmp.lt.s32.totalorder %s24_s19, %s24_s19 }
  0x1c   :  { %p2290_p10 = scmp.ne.s32.totalorder %s24_s19, %s2289_s1  ;;  %p2295_p12 = scmp.lt.s32.totalorder %s2289_s1, %s2289_s1 }
  0x1e   :  { %p2296_p13 = por %p2295_p12, %p2294_p11 }
  0x20   :  { %p2297_p0 = pnand %p2296_p13, %p2290_p10 }
  0x22   :  { %2300 = shalt.err (!%p2297_p0)
}
  0x23   :  { %29 = dma.hbm_to_vmem [thread:$0]  %s2498_s0, 512, %s24_s19, [#allocation3], %s2370_s12, %s2370_s12, %s2371_s13  }
  0x24   :  { %s2376_s27 = smov [#allocation7]   ;;  %s2377_s29 = smov [#allocation10]  }
  0x25   :  { %s47_s28 = sshll.u32 %s2376_s27, 4  ;;  %s71_s30 = sshll.u32 %s2377_s29, 4  ;;  %s48_s28 = int_to_ptr.vmem [resolvable:$true] %s47_s28  ;;  %s72_s30 = int_to_ptr.vmem [resolvable:$true] %s71_s30 }
  0x26   :  { %s2309_s10 = scalar_lea.vmem %s48_s28, 4096  ;;  %p2314_p2 = scmp.lt.s32.totalorder %s48_s28, %s48_s28 }
  0x27   :  { %p2310_p1 = scmp.ne.s32.totalorder %s48_s28, %s2309_s10  ;;  %p2315_p3 = scmp.lt.s32.totalorder %s2309_s10, %s2309_s10 }
  0x29   :  { %p2316_p4 = por %p2315_p3, %p2314_p2 }
  0x2b   :  { %p2317_p5 = pnand %p2316_p4, %p2310_p1 }
  0x2d   :  { %2320 = shalt.err (!%p2317_p5)
}
  0x2e   :  { %53 = dma.hbm_to_vmem [thread:$0]  %s2500_s2, 4096, %s48_s28, [#allocation6], %s2374_s21, %s2374_s21, %s2375_s22  }
  0x2f   :  { %s2329_s0 = scalar_lea.vmem %s72_s30, 1024  ;;  %p2334_p7 = scmp.lt.s32.totalorder %s72_s30, %s72_s30 }
  0x30   :  { %p2330_p6 = scmp.ne.s32.totalorder %s72_s30, %s2329_s0  ;;  %p2335_p8 = scmp.lt.s32.totalorder %s2329_s0, %s2329_s0 }
  0x32   :  { %p2336_p9 = por %p2335_p8, %p2334_p7 }
  0x34   :  { %p2337_p10 = pnand %p2336_p9, %p2330_p6 }
  0x36   :  { %2340 = shalt.err (!%p2337_p10)
}
  0x37   :  { %77 = dma.hbm_to_vmem [thread:$0]  %s2502_s4, 1024, %s72_s30, [#allocation9], %s2374_s21, %s2374_s21, %s2375_s22  }
  0x38   :  { %2361 = dma.done.wait [#allocation3], 512  }
  0x39   :  { %2362 = vsyncadd [#allocation3], 4294966784 }
  0x3a   :  { %2363 = dma.done.wait [#allocation6], 20480  }
  0x3b   :  { %2364 = vsyncadd [#allocation6], 4294946816 }
  0x3c   :  { %2365 = dma.done.wait [#allocation9], 2048  }
  0x3d   :  { %2366 = vsyncadd [#allocation9], 4294965248  ;;  %v1995_v0 = vld [vmem:[#allocation5 + $0xe4] ss:$16 sps:$4 sm:$0xff]   ;;  %v1999_v2 = vld [vmem:[#allocation5 + $0xe0] ss:$16 sps:$4 sm:$0xff]  }
  0x3e   :  { %v1997_v1 = vld [vmem:[#allocation5 + $0x2e4] ss:$16 sps:$4 sm:$0xff]   ;;  %916 = vmatprep.subr.bf16.mxu0 %v1995_v0  ;;  %v2000_v3 = vld [vmem:[#allocation5 + $0x2e0] ss:$16 sps:$4 sm:$0xff]   ;;  %v2096_v51 = vld [vmem:[#allocation2 + $0xc] ss:$16 sps:$4 sm:$0xff]  }
  0x3f   :  { %959 = vmatprep.subr.bf16.mxu1 %v1997_v1  ;;  %v2001_v4 = vld [vmem:[#allocation5 + $0xc4] ss:$16 sps:$4 sm:$0xff]   ;;  %917 = vmatpush1.bf16.msra.mxu0 %v1999_v2  ;;  %v2005_v6 = vld [vmem:[#allocation5 + $0xc0] ss:$16 sps:$4 sm:$0xff]   ;;  %v2099_v2 = vld [vmem:[#allocation5 + $0xec] ss:$16 sps:$4 sm:$0xff]  }
  0x40   :  { %960 = vmatpush1.bf16.msra.mxu1 %v2000_v3  ;;  %v2003_v5 = vld [vmem:[#allocation5 + $0x2c4] ss:$16 sps:$4 sm:$0xff]   ;;  %918 = vmatprep.subr.bf16.mxu0 %v2001_v4  ;;  %v2006_v7 = vld [vmem:[#allocation5 + $0x2c0] ss:$16 sps:$4 sm:$0xff]   ;;  %v2102_v3 = vld [vmem:[#allocation5 + $0x2ec] ss:$16 sps:$4 sm:$0xff]  }
  0x41   :  { %961 = vmatprep.subr.bf16.mxu1 %v2003_v5  ;;  %v2007_v8 = vld [vmem:[#allocation5 + $0xa4] ss:$16 sps:$4 sm:$0xff]   ;;  %v2011_v10 = vld [vmem:[#allocation5 + $0xa0] ss:$16 sps:$4 sm:$0xff]   ;;  %991 = vmatprep.mubr.bf16.mxu1 %v2096_v51  ;;  %v2459_v5 = vld [vmem:[#allocation2 + $0x8] ss:$16 sps:$4 sm:$0xff]  }
  0x42   :  { %v2009_v9 = vld [vmem:[#allocation5 + $0x2a4] ss:$16 sps:$4 sm:$0xff]   ;;  %v2012_v11 = vld [vmem:[#allocation5 + $0x2a0] ss:$16 sps:$4 sm:$0xff]   ;;  %vm2379_vm0 = vmmov 0   ;;  %s2380_s18 = smov [#allocation11]  }
  0x43   :  { %919 = vmatpush1.bf16.msra.mxu0 %v2005_v6  ;;  %v2013_v12 = vld [vmem:[#allocation5 + $0x84] ss:$16 sps:$4 sm:$0xff]   ;;  %v2017_v14 = vld [vmem:[#allocation5 + $0x80] ss:$16 sps:$4 sm:$0xff]   ;;  %v2097_v6 = vld [vmem:[#allocation5 + $0xe8] ss:$16 sps:$4 sm:$0xff]  }
  0x44   :  { %962 = vmatpush1.bf16.msra.mxu1 %v2006_v7  ;;  %920 = vmatprep.subr.bf16.mxu0 %v2007_v8  ;;  %v2015_v13 = vld [vmem:[#allocation5 + $0x284] ss:$16 sps:$4 sm:$0xff]   ;;  %v2018_v15 = vld [vmem:[#allocation5 + $0x280] ss:$16 sps:$4 sm:$0xff]   ;;  %v2100_v7 = vld [vmem:[#allocation5 + $0x2e8] ss:$16 sps:$4 sm:$0xff]  }
  0x45   :  { %963 = vmatprep.subr.bf16.mxu1 %v2009_v9  ;;  %v2019_v16 = vld [vmem:[#allocation5 + $0x64] ss:$16 sps:$4 sm:$0xff]   ;;  %v2023_v18 = vld [vmem:[#allocation5 + $0x60] ss:$16 sps:$4 sm:$0xff]   ;;  %v2105_v8 = vld [vmem:[#allocation5 + $0xcc] ss:$16 sps:$4 sm:$0xff]  }
  0x46   :  { %v2021_v17 = vld [vmem:[#allocation5 + $0x264] ss:$16 sps:$4 sm:$0xff]   ;;  %v2024_v19 = vld [vmem:[#allocation5 + $0x260] ss:$16 sps:$4 sm:$0xff]   ;;  %v2108_v9 = vld [vmem:[#allocation5 + $0x2cc] ss:$16 sps:$4 sm:$0xff]  }
  0x47   :  { %921 = vmatpush1.bf16.msra.mxu0 %v2011_v10  ;;  %v2025_v20 = vld [vmem:[#allocation5 + $0x44] ss:$16 sps:$4 sm:$0xff]   ;;  %v2029_v22 = vld [vmem:[#allocation5 + $0x40] ss:$16 sps:$4 sm:$0xff]   ;;  %v2103_v10 = vld [vmem:[#allocation5 + $0xc8] ss:$16 sps:$4 sm:$0xff]  }
  0x48   :  { %964 = vmatpush1.bf16.msra.mxu1 %v2012_v11  ;;  %922 = vmatprep.subr.bf16.mxu0 %v2013_v12  ;;  %v2027_v21 = vld [vmem:[#allocation5 + $0x244] ss:$16 sps:$4 sm:$0xff]   ;;  %v2030_v23 = vld [vmem:[#allocation5 + $0x240] ss:$16 sps:$4 sm:$0xff]   ;;  %v2106_v11 = vld [vmem:[#allocation5 + $0x2c8] ss:$16 sps:$4 sm:$0xff]  }
  0x49   :  { %965 = vmatprep.subr.bf16.mxu1 %v2015_v13  ;;  %v2031_v24 = vld [vmem:[#allocation5 + $0x24] ss:$16 sps:$4 sm:$0xff]   ;;  %v2035_v26 = vld [vmem:[#allocation5 + $0x20] ss:$16 sps:$4 sm:$0xff]   ;;  %v2111_v12 = vld [vmem:[#allocation5 + $0xac] ss:$16 sps:$4 sm:$0xff]  }
  0x4a   :  { %v2033_v25 = vld [vmem:[#allocation5 + $0x224] ss:$16 sps:$4 sm:$0xff]   ;;  %v2036_v27 = vld [vmem:[#allocation5 + $0x220] ss:$16 sps:$4 sm:$0xff]   ;;  %v2114_v13 = vld [vmem:[#allocation5 + $0x2ac] ss:$16 sps:$4 sm:$0xff]  }
  0x4b   :  { %923 = vmatpush1.bf16.msra.mxu0 %v2017_v14  ;;  %v2037_v28 = vld [vmem:[#allocation5 + $0x4] ss:$16 sps:$4 sm:$0xff]   ;;  %v2041_v30 = vld [vmem:[#allocation5] ss:$16 sps:$4 sm:$0xff]   ;;  %v2109_v14 = vld [vmem:[#allocation5 + $0xa8] ss:$16 sps:$4 sm:$0xff]  }
  0x4c   :  { %966 = vmatpush1.bf16.msra.mxu1 %v2018_v15  ;;  %924 = vmatprep.subr.bf16.mxu0 %v2019_v16  ;;  %v2039_v29 = vld [vmem:[#allocation5 + $0x204] ss:$16 sps:$4 sm:$0xff]   ;;  %v2042_v31 = vld [vmem:[#allocation5 + $0x200] ss:$16 sps:$4 sm:$0xff]   ;;  %v2112_v15 = vld [vmem:[#allocation5 + $0x2a8] ss:$16 sps:$4 sm:$0xff]  }
  0x4d   :  { %967 = vmatprep.subr.bf16.mxu1 %v2021_v17  ;;  %v2043_v32 = vld [vmem:[#allocation5 + $0x1e4] ss:$16 sps:$4 sm:$0xff]   ;;  %v2047_v34 = vld [vmem:[#allocation5 + $0x1e0] ss:$16 sps:$4 sm:$0xff]   ;;  %v2117_v16 = vld [vmem:[#allocation5 + $0x8c] ss:$16 sps:$4 sm:$0xff]  }
  0x4e   :  { %v2045_v33 = vld [vmem:[#allocation5 + $0x3e4] ss:$16 sps:$4 sm:$0xff]   ;;  %v2048_v35 = vld [vmem:[#allocation5 + $0x3e0] ss:$16 sps:$4 sm:$0xff]   ;;  %v2120_v17 = vld [vmem:[#allocation5 + $0x28c] ss:$16 sps:$4 sm:$0xff]  }
  0x4f   :  { %925 = vmatpush1.bf16.msra.mxu0 %v2023_v18  ;;  %v2049_v36 = vld [vmem:[#allocation5 + $0x1c4] ss:$16 sps:$4 sm:$0xff]   ;;  %v2053_v38 = vld [vmem:[#allocation5 + $0x1c0] ss:$16 sps:$4 sm:$0xff]   ;;  %v2115_v18 = vld [vmem:[#allocation5 + $0x88] ss:$16 sps:$4 sm:$0xff]  }
  0x50   :  { %968 = vmatpush1.bf16.msra.mxu1 %v2024_v19  ;;  %926 = vmatprep.subr.bf16.mxu0 %v2025_v20  ;;  %v2051_v37 = vld [vmem:[#allocation5 + $0x3c4] ss:$16 sps:$4 sm:$0xff]   ;;  %v2054_v39 = vld [vmem:[#allocation5 + $0x3c0] ss:$16 sps:$4 sm:$0xff]   ;;  %v2118_v19 = vld [vmem:[#allocation5 + $0x288] ss:$16 sps:$4 sm:$0xff]  }
  0x51   :  { %969 = vmatprep.subr.bf16.mxu1 %v2027_v21  ;;  %v2055_v40 = vld [vmem:[#allocation5 + $0x1a4] ss:$16 sps:$4 sm:$0xff]   ;;  %v2059_v42 = vld [vmem:[#allocation5 + $0x1a0] ss:$16 sps:$4 sm:$0xff]   ;;  %v2123_v20 = vld [vmem:[#allocation5 + $0x6c] ss:$16 sps:$4 sm:$0xff]  }
  0x52   :  { %v2057_v41 = vld [vmem:[#allocation5 + $0x3a4] ss:$16 sps:$4 sm:$0xff]   ;;  %v2060_v43 = vld [vmem:[#allocation5 + $0x3a0] ss:$16 sps:$4 sm:$0xff]   ;;  %v2126_v21 = vld [vmem:[#allocation5 + $0x26c] ss:$16 sps:$4 sm:$0xff]  }
  0x53   :  { %927 = vmatpush1.bf16.msra.mxu0 %v2029_v22  ;;  %v2061_v44 = vld [vmem:[#allocation5 + $0x184] ss:$16 sps:$4 sm:$0xff]   ;;  %v2065_v46 = vld [vmem:[#allocation5 + $0x180] ss:$16 sps:$4 sm:$0xff]   ;;  %v2121_v22 = vld [vmem:[#allocation5 + $0x68] ss:$16 sps:$4 sm:$0xff]  }
  0x54   :  { %970 = vmatpush1.bf16.msra.mxu1 %v2030_v23  ;;  %928 = vmatprep.subr.bf16.mxu0 %v2031_v24  ;;  %v2063_v45 = vld [vmem:[#allocation5 + $0x384] ss:$16 sps:$4 sm:$0xff]   ;;  %v2066_v47 = vld [vmem:[#allocation5 + $0x380] ss:$16 sps:$4 sm:$0xff]   ;;  %v2124_v23 = vld [vmem:[#allocation5 + $0x268] ss:$16 sps:$4 sm:$0xff]  }
  0x55   :  { %971 = vmatprep.subr.bf16.mxu1 %v2033_v25  ;;  %v2067_v48 = vld [vmem:[#allocation5 + $0x164] ss:$16 sps:$4 sm:$0xff]   ;;  %v2071_v52 = vld [vmem:[#allocation5 + $0x160] ss:$16 sps:$4 sm:$0xff]   ;;  %v2129_v24 = vld [vmem:[#allocation5 + $0x4c] ss:$16 sps:$4 sm:$0xff]  }
  0x56   :  { %v2093_v49 = vld [vmem:[#allocation2 + $0x4] ss:$16 sps:$4 sm:$0xff]   ;;  %v2072_v53 = vld [vmem:[#allocation5 + $0x360] ss:$16 sps:$4 sm:$0xff]   ;;  %v2132_v25 = vld [vmem:[#allocation5 + $0x24c] ss:$16 sps:$4 sm:$0xff]  }
  0x57   :  { %929 = vmatpush1.bf16.msra.mxu0 %v2035_v26  ;;  %v2069_v50 = vld [vmem:[#allocation5 + $0x364] ss:$16 sps:$4 sm:$0xff]   ;;  %948 = vmatprep.mubr.bf16.mxu0 %v2093_v49  ;;  %v2077_v56 = vld [vmem:[#allocation5 + $0x140] ss:$16 sps:$4 sm:$0xff]   ;;  %v2127_v26 = vld [vmem:[#allocation5 + $0x48] ss:$16 sps:$4 sm:$0xff]  }
  0x58   :  { %972 = vmatpush1.bf16.msra.mxu1 %v2036_v27  ;;  %930 = vmatprep.subr.bf16.mxu0 %v2037_v28  ;;  %v2073_v54 = vld [vmem:[#allocation5 + $0x144] ss:$16 sps:$4 sm:$0xff]   ;;  %v2078_v57 = vld [vmem:[#allocation5 + $0x340] ss:$16 sps:$4 sm:$0xff]   ;;  %v2130_v27 = vld [vmem:[#allocation5 + $0x248] ss:$16 sps:$4 sm:$0xff]  }
  0x59   :  { %973 = vmatprep.subr.bf16.mxu1 %v2039_v29  ;;  %v2075_v55 = vld [vmem:[#allocation5 + $0x344] ss:$16 sps:$4 sm:$0xff]   ;;  %v2083_v60 = vld [vmem:[#allocation5 + $0x120] ss:$16 sps:$4 sm:$0xff]   ;;  %v2135_v28 = vld [vmem:[#allocation5 + $0x2c] ss:$16 sps:$4 sm:$0xff]  }
  0x5a   :  { %v2079_v58 = vld [vmem:[#allocation5 + $0x124] ss:$16 sps:$4 sm:$0xff]   ;;  %v2084_v61 = vld [vmem:[#allocation5 + $0x320] ss:$16 sps:$4 sm:$0xff]   ;;  %v2138_v29 = vld [vmem:[#allocation5 + $0x22c] ss:$16 sps:$4 sm:$0xff]  }
  0x5b   :  { %931 = vmatpush1.bf16.msra.mxu0 %v2041_v30  ;;  %v2081_v59 = vld [vmem:[#allocation5 + $0x324] ss:$16 sps:$4 sm:$0xff]   ;;  %v2089_v0 = vld [vmem:[#allocation5 + $0x100] ss:$16 sps:$4 sm:$0xff]   ;;  %v2133_v30 = vld [vmem:[#allocation5 + $0x28] ss:$16 sps:$4 sm:$0xff]  }
  0x5c   :  { %974 = vmatpush1.bf16.msra.mxu1 %v2042_v31  ;;  %932 = vmatprep.subr.bf16.mxu0 %v2043_v32  ;;  %v2085_v62 = vld [vmem:[#allocation5 + $0x104] ss:$16 sps:$4 sm:$0xff]   ;;  %v2090_v1 = vld [vmem:[#allocation5 + $0x300] ss:$16 sps:$4 sm:$0xff]   ;;  %v2136_v31 = vld [vmem:[#allocation5 + $0x228] ss:$16 sps:$4 sm:$0xff]  }
  0x5d   :  { %975 = vmatprep.subr.bf16.mxu1 %v2045_v33  ;;  %v2087_v63 = vld [vmem:[#allocation5 + $0x304] ss:$16 sps:$4 sm:$0xff]   ;;  %v2457_v4 = vld [vmem:[#allocation2] ss:$16 sps:$4 sm:$0xff]   ;;  %v2141_v32 = vld [vmem:[#allocation5 + $0xc] ss:$16 sps:$4 sm:$0xff]  }
  0x5e   :  { %v2144_v33 = vld [vmem:[#allocation5 + $0x20c] ss:$16 sps:$4 sm:$0xff]   ;;  %s1682_s19 = sshll.u32 %s2380_s18, 4  ;;  %s1683_s19 = int_to_ptr.vmem [resolvable:$true] %s1682_s19 }
  0x5f   :  { %933 = vmatpush2.bf16.msra.mxu0 %v2047_v34  ;;  %v2139_v34 = vld [vmem:[#allocation5 + $0x8] ss:$16 sps:$4 sm:$0xff]   ;;  %p2346_p12 = scmp.lt.s32.totalorder %s1683_s19, %s1683_s19 }
  0x60   :  { %976 = vmatpush2.bf16.msra.mxu1 %v2048_v35  ;;  %934 = vmatprep.subr.bf16.mxu0 %v2049_v36  ;;  %v2142_v35 = vld [vmem:[#allocation5 + $0x208] ss:$16 sps:$4 sm:$0xff]   ;;  %v2147_v36 = vld [vmem:[#allocation5 + $0x1ec] ss:$16 sps:$4 sm:$0xff]  }
  0x61   :  { %977 = vmatprep.subr.bf16.mxu1 %v2051_v37  ;;  %v2150_v37 = vld [vmem:[#allocation5 + $0x3ec] ss:$16 sps:$4 sm:$0xff]  }
  0x63   :  { %935 = vmatpush2.bf16.msra.mxu0 %v2053_v38  ;;  %v2145_v38 = vld [vmem:[#allocation5 + $0x1e8] ss:$16 sps:$4 sm:$0xff]  }
  0x64   :  { %978 = vmatpush2.bf16.msra.mxu1 %v2054_v39  ;;  %936 = vmatprep.subr.bf16.mxu0 %v2055_v40  ;;  %v2148_v39 = vld [vmem:[#allocation5 + $0x3e8] ss:$16 sps:$4 sm:$0xff]   ;;  %v2153_v40 = vld [vmem:[#allocation5 + $0x1cc] ss:$16 sps:$4 sm:$0xff]  }
  0x65   :  { %979 = vmatprep.subr.bf16.mxu1 %v2057_v41  ;;  %v2156_v41 = vld [vmem:[#allocation5 + $0x3cc] ss:$16 sps:$4 sm:$0xff]  }
  0x67   :  { %937 = vmatpush2.bf16.msra.mxu0 %v2059_v42  ;;  %v2151_v42 = vld [vmem:[#allocation5 + $0x1c8] ss:$16 sps:$4 sm:$0xff]  }
  0x68   :  { %980 = vmatpush2.bf16.msra.mxu1 %v2060_v43  ;;  %938 = vmatprep.subr.bf16.mxu0 %v2061_v44  ;;  %v2154_v43 = vld [vmem:[#allocation5 + $0x3c8] ss:$16 sps:$4 sm:$0xff]   ;;  %v2159_v44 = vld [vmem:[#allocation5 + $0x1ac] ss:$16 sps:$4 sm:$0xff]  }
  0x69   :  { %981 = vmatprep.subr.bf16.mxu1 %v2063_v45  ;;  %v2162_v45 = vld [vmem:[#allocation5 + $0x3ac] ss:$16 sps:$4 sm:$0xff]  }
  0x6b   :  { %939 = vmatpush2.bf16.msra.mxu0 %v2065_v46  ;;  %v2157_v46 = vld [vmem:[#allocation5 + $0x1a8] ss:$16 sps:$4 sm:$0xff]  }
  0x6c   :  { %982 = vmatpush2.bf16.msra.mxu1 %v2066_v47  ;;  %940 = vmatprep.subr.bf16.mxu0 %v2067_v48  ;;  %v2160_v47 = vld [vmem:[#allocation5 + $0x3a8] ss:$16 sps:$4 sm:$0xff]   ;;  %v2165_v48 = vld [vmem:[#allocation5 + $0x18c] ss:$16 sps:$4 sm:$0xff]  }
  0x6d   :  { %983 = vmatprep.subr.bf16.mxu1 %v2069_v50  ;;  %v2163_v50 = vld [vmem:[#allocation5 + $0x188] ss:$16 sps:$4 sm:$0xff]  }
  0x6f   :  { %941 = vmatpush2.bf16.msra.mxu0 %v2071_v52  ;;  %v2171_v52 = vld [vmem:[#allocation5 + $0x16c] ss:$16 sps:$4 sm:$0xff]  }
  0x70   :  { %984 = vmatpush2.bf16.msra.mxu1 %v2072_v53  ;;  %942 = vmatprep.subr.bf16.mxu0 %v2073_v54  ;;  %v2174_v53 = vld [vmem:[#allocation5 + $0x36c] ss:$16 sps:$4 sm:$0xff]   ;;  %v2169_v54 = vld [vmem:[#allocation5 + $0x168] ss:$16 sps:$4 sm:$0xff]  }
  0x71   :  { %985 = vmatprep.subr.bf16.mxu1 %v2075_v55  ;;  %v2172_v55 = vld [vmem:[#allocation5 + $0x368] ss:$16 sps:$4 sm:$0xff]  }
  0x73   :  { %943 = vmatpush2.bf16.msra.mxu0 %v2077_v56  ;;  %v2177_v56 = vld [vmem:[#allocation5 + $0x14c] ss:$16 sps:$4 sm:$0xff]  }
  0x74   :  { %986 = vmatpush2.bf16.msra.mxu1 %v2078_v57  ;;  %944 = vmatprep.subr.bf16.mxu0 %v2079_v58  ;;  %v2180_v57 = vld [vmem:[#allocation5 + $0x34c] ss:$16 sps:$4 sm:$0xff]   ;;  %v2175_v58 = vld [vmem:[#allocation5 + $0x148] ss:$16 sps:$4 sm:$0xff]  }
  0x75   :  { %987 = vmatprep.subr.bf16.mxu1 %v2081_v59  ;;  %v2178_v59 = vld [vmem:[#allocation5 + $0x348] ss:$16 sps:$4 sm:$0xff]  }
  0x77   :  { %945 = vmatpush2.bf16.msra.mxu0 %v2083_v60  ;;  %v2183_v60 = vld [vmem:[#allocation5 + $0x12c] ss:$16 sps:$4 sm:$0xff]  }
  0x78   :  { %988 = vmatpush2.bf16.msra.mxu1 %v2084_v61  ;;  %946 = vmatprep.subr.bf16.mxu0 %v2085_v62  ;;  %v2186_v61 = vld [vmem:[#allocation5 + $0x32c] ss:$16 sps:$4 sm:$0xff]   ;;  %v2181_v62 = vld [vmem:[#allocation5 + $0x128] ss:$16 sps:$4 sm:$0xff]  }
  0x79   :  { %989 = vmatprep.subr.bf16.mxu1 %v2087_v63  ;;  %v2184_v63 = vld [vmem:[#allocation5 + $0x328] ss:$16 sps:$4 sm:$0xff]  }
  0x7b   :  { %947 = vmatpush2.bf16.msra.mxu0 %v2089_v0  ;;  %v2189_v0 = vld [vmem:[#allocation5 + $0x10c] ss:$16 sps:$4 sm:$0xff]  }
  0x7c   :  { %990 = vmatpush2.bf16.msra.mxu1 %v2090_v1  ;;  %1002 = vmatprep.subr.bf16.mxu0 %v2099_v2  ;;  %v2192_v1 = vld [vmem:[#allocation5 + $0x30c] ss:$16 sps:$4 sm:$0xff]   ;;  %v2187_v2 = vld [vmem:[#allocation5 + $0x108] ss:$16 sps:$4 sm:$0xff]  }
  0x7d   :  { %1045 = vmatprep.subr.bf16.mxu1 %v2102_v3  ;;  %v2190_v3 = vld [vmem:[#allocation5 + $0x308] ss:$16 sps:$4 sm:$0xff]  }
  0x7e   :  { %949 = vmatmul.mubr.bf16.vlgmr.msra.gmra.mxu0 %v2457_v4 }
  0x7f   :  { %992 = vmatmul.mubr.bf16.vlgmr.msra.gmra.mxu1 %v2459_v5  ;;  %1003 = vmatpush1.bf16.msra.mxu0 %v2097_v6  ;;  %v2193_v6 = vld [vmem:[#allocation7 + $0x78] sm:$0xff]  }
  0x80   :  { %1046 = vmatpush1.bf16.msra.mxu1 %v2100_v7  ;;  %1004 = vmatprep.subr.bf16.mxu0 %v2105_v8  ;;  %v2194_v7 = vld [vmem:[#allocation7 + $0x38] sm:$0xff]   ;;  %v2195_v8 = vld [vmem:[#allocation7 + $0x70] sm:$0xff]  }
  0x81   :  { %1047 = vmatprep.subr.bf16.mxu1 %v2108_v9  ;;  %1034 = vmatprep.mubr.bf16.mxu0 %v2093_v49  ;;  %v2168_v49 = vld [vmem:[#allocation5 + $0x38c] ss:$16 sps:$4 sm:$0xff]   ;;  %v2196_v9 = vld [vmem:[#allocation7 + $0x30] sm:$0xff]  }
  0x82   :  { %1077 = vmatprep.mubr.bf16.mxu1 %v2096_v51  ;;  %v2166_v51 = vld [vmem:[#allocation5 + $0x388] ss:$16 sps:$4 sm:$0xff]  }
  0x83   :  { %1005 = vmatpush1.bf16.msra.mxu0 %v2103_v10  ;;  %v2197_v10 = vld [vmem:[#allocation7 + $0x68] sm:$0xff]  }
  0x84   :  { %1048 = vmatpush1.bf16.msra.mxu1 %v2106_v11  ;;  %1006 = vmatprep.subr.bf16.mxu0 %v2111_v12  ;;  %v2198_v11 = vld [vmem:[#allocation7 + $0x28] sm:$0xff]   ;;  %v2199_v12 = vld [vmem:[#allocation7 + $0x60] sm:$0xff]  }
  0x85   :  { %1049 = vmatprep.subr.bf16.mxu1 %v2114_v13  ;;  %v2200_v13 = vld [vmem:[#allocation7 + $0x20] sm:$0xff]  }
  0x87   :  { %1007 = vmatpush1.bf16.msra.mxu0 %v2109_v14  ;;  %v2201_v14 = vld [vmem:[#allocation7 + $0x58] sm:$0xff]  }
  0x88   :  { %1050 = vmatpush1.bf16.msra.mxu1 %v2112_v15  ;;  %1008 = vmatprep.subr.bf16.mxu0 %v2117_v16  ;;  %v2202_v15 = vld [vmem:[#allocation7 + $0x18] sm:$0xff]   ;;  %v2203_v16 = vld [vmem:[#allocation7 + $0x50] sm:$0xff]  }
  0x89   :  { %1051 = vmatprep.subr.bf16.mxu1 %v2120_v17  ;;  %v2209_v17 = vld [vmem:[#allocation7 + $0xf8] sm:$0xff]  }
  0x8b   :  { %1009 = vmatpush1.bf16.msra.mxu0 %v2115_v18  ;;  %v2211_v18 = vld [vmem:[#allocation7 + $0xf0] sm:$0xff]  }
  0x8c   :  { %1052 = vmatpush1.bf16.msra.mxu1 %v2118_v19  ;;  %1010 = vmatprep.subr.bf16.mxu0 %v2123_v20  ;;  %v2205_v19 = vld [vmem:[#allocation7 + $0x48] sm:$0xff]   ;;  %v2212_v20 = vld [vmem:[#allocation7 + $0xb0] sm:$0xff]  }
  0x8d   :  { %1053 = vmatprep.subr.bf16.mxu1 %v2126_v21  ;;  %v2213_v21 = vld [vmem:[#allocation7 + $0xe8] sm:$0xff]  }
  0x8f   :  { %1011 = vmatpush1.bf16.msra.mxu0 %v2121_v22  ;;  %v2206_v22 = vld [vmem:[#allocation7 + $0x8] sm:$0xff]  }
  0x90   :  { %1054 = vmatpush1.bf16.msra.mxu1 %v2124_v23  ;;  %1012 = vmatprep.subr.bf16.mxu0 %v2129_v24  ;;  %v2207_v23 = vld [vmem:[#allocation7 + $0x40] sm:$0xff]   ;;  %v2214_v24 = vld [vmem:[#allocation7 + $0xa8] sm:$0xff]  }
  0x91   :  { %1055 = vmatprep.subr.bf16.mxu1 %v2132_v25  ;;  %v2215_v25 = vld [vmem:[#allocation7 + $0xe0] sm:$0xff]  }
  0x93   :  { %1013 = vmatpush1.bf16.msra.mxu0 %v2127_v26  ;;  %v2208_v26 = vld [vmem:[#allocation7] sm:$0xff]  }
  0x94   :  { %1056 = vmatpush1.bf16.msra.mxu1 %v2130_v27  ;;  %1014 = vmatprep.subr.bf16.mxu0 %v2135_v28  ;;  %v2216_v27 = vld [vmem:[#allocation7 + $0xa0] sm:$0xff]   ;;  %v2217_v28 = vld [vmem:[#allocation7 + $0xd8] sm:$0xff]  }
  0x95   :  { %1057 = vmatprep.subr.bf16.mxu1 %v2138_v29  ;;  %v2218_v29 = vld [vmem:[#allocation7 + $0x98] sm:$0xff]  }
  0x97   :  { %1015 = vmatpush1.bf16.msra.mxu0 %v2133_v30  ;;  %v2219_v30 = vld [vmem:[#allocation7 + $0xd0] sm:$0xff]  }
  0x98   :  { %1058 = vmatpush1.bf16.msra.mxu1 %v2136_v31  ;;  %1016 = vmatprep.subr.bf16.mxu0 %v2141_v32  ;;  %v2220_v31 = vld [vmem:[#allocation7 + $0x90] sm:$0xff]   ;;  %v2221_v32 = vld [vmem:[#allocation7 + $0xc8] sm:$0xff]  }
  0x99   :  { %1059 = vmatprep.subr.bf16.mxu1 %v2144_v33  ;;  %v2222_v33 = vld [vmem:[#allocation7 + $0x88] sm:$0xff]  }
  0x9b   :  { %1017 = vmatpush1.bf16.msra.mxu0 %v2139_v34  ;;  %v2223_v34 = vld [vmem:[#allocation7 + $0xc0] sm:$0xff]  }
  0x9c   :  { %1060 = vmatpush1.bf16.msra.mxu1 %v2142_v35  ;;  %1018 = vmatprep.subr.bf16.mxu0 %v2147_v36  ;;  %v2224_v35 = vld [vmem:[#allocation7 + $0x80] sm:$0xff]   ;;  %v236_v36 = vlaneseq }
  0x9d   :  { %1061 = vmatprep.subr.bf16.mxu1 %v2150_v37 }
  0x9e   :  { %v237_v37 = vshrl.u32 %v236_v36, 7  ;;  %v2233_v36 = vld [vmem:[#allocation10 + $0x38] sm:$0xff]  }
  0x9f   :  { %1019 = vmatpush2.bf16.msra.mxu0 %v2145_v38 }
  0xa0   :  { %1062 = vmatpush2.bf16.msra.mxu1 %v2148_v39  ;;  %1020 = vmatprep.subr.bf16.mxu0 %v2153_v40  ;;  %v242_v38 = vsub.s32 1, %v237_v37  ;;  %v234_v39 = vld [vmem:[%s2503_s5] sm:$0xf]  ;;  %v238_v40 = vsub.s32 0, %v237_v37 }
  0xa1   :  { %1063 = vmatprep.subr.bf16.mxu1 %v2156_v41 }
  0xa2   :  { %v243_v41 = vrot.slane %v234_v39, %v242_v38  ;;  %v2235_v38 = vld [vmem:[#allocation10 + $0x28] sm:$0xff]  }
  0xa3   :  { %1021 = vmatpush2.bf16.msra.mxu0 %v2151_v42  ;;  %v239_v42 = vrot.slane %v234_v39, %v238_v40  ;;  %v2237_v40 = vld [vmem:[#allocation10 + $0x18] sm:$0xff]  }
  0xa4   :  { %1064 = vmatpush2.bf16.msra.mxu1 %v2154_v43  ;;  %1022 = vmatprep.subr.bf16.mxu0 %v2159_v44 }
  0xa5   :  { %1065 = vmatprep.subr.bf16.mxu1 %v2162_v45 }
  0xa7   :  { %1023 = vmatpush2.bf16.msra.mxu0 %v2157_v46 }
  0xa8   :  { %1066 = vmatpush2.bf16.msra.mxu1 %v2160_v47  ;;  %1024 = vmatprep.subr.bf16.mxu0 %v2165_v48 }
  0xa9   :  { %1067 = vmatprep.subr.bf16.mxu1 %v2168_v49 }
  0xab   :  { %1025 = vmatpush2.bf16.msra.mxu0 %v2163_v50 }
  0xac   :  { %1068 = vmatpush2.bf16.msra.mxu1 %v2166_v51  ;;  %1026 = vmatprep.subr.bf16.mxu0 %v2171_v52 }
  0xad   :  { %1069 = vmatprep.subr.bf16.mxu1 %v2174_v53 }
  0xaf   :  { %1027 = vmatpush2.bf16.msra.mxu0 %v2169_v54 }
  0xb0   :  { %1070 = vmatpush2.bf16.msra.mxu1 %v2172_v55  ;;  %1028 = vmatprep.subr.bf16.mxu0 %v2177_v56 }
  0xb1   :  { %1071 = vmatprep.subr.bf16.mxu1 %v2180_v57 }
  0xb3   :  { %1029 = vmatpush2.bf16.msra.mxu0 %v2175_v58 }
  0xb4   :  { %1072 = vmatpush2.bf16.msra.mxu1 %v2178_v59  ;;  %1030 = vmatprep.subr.bf16.mxu0 %v2183_v60 }
  0xb5   :  { %1073 = vmatprep.subr.bf16.mxu1 %v2186_v61 }
  0xb7   :  { %1031 = vmatpush2.bf16.msra.mxu0 %v2181_v62 }
  0xb8   :  { %1074 = vmatpush2.bf16.msra.mxu1 %v2184_v63  ;;  %1032 = vmatprep.subr.bf16.mxu0 %v2189_v0 }
  0xb9   :  { %1075 = vmatprep.subr.bf16.mxu1 %v2192_v1  ;;  %v250_v1 = vsub.s32 3, %v237_v37 }
  0xbb   :  { %1033 = vmatpush2.bf16.msra.mxu0 %v2187_v2  ;;  %v246_v2 = vsub.s32 2, %v237_v37  ;;  %v2234_v37 = vld [vmem:[#allocation10 + $0x30] sm:$0xff]  }
  0xbc   :  { %1076 = vmatpush2.bf16.msra.mxu1 %v2190_v3  ;;  %1879 = vmatprep.subr.bf16.mxu0 %v2193_v6  ;;  %v251_v3 = vrot.slane %v234_v39, %v250_v1 }
  0xbd   :  { %1901 = vmatprep.subr.bf16.mxu1 %v2209_v17  ;;  %v247_v6 = vrot.slane %v234_v39, %v246_v2  ;;  %v2236_v39 = vld [vmem:[#allocation10 + $0x20] sm:$0xff]  }
  0xbe   :  { %1035 = vmatmul.mubr.bf16.vlgmr.msra.gmra.mxu0 %v2457_v4  ;;  %v2210_v4 = vld [vmem:[#allocation7 + $0xb8] sm:$0xff]  }
  0xbf   :  { %1078 = vmatmul.mubr.bf16.vlgmr.msra.gmra.mxu1 %v2459_v5  ;;  %1880 = vmatpush3.bf16.msra.mxu0 %v2194_v7  ;;  %v2204_v5 = vld [vmem:[#allocation7 + $0x10] sm:$0xff]  }
  0xc0   :  { %1881 = vmatprep.subr.bf16.mxu0 %v2195_v8  ;;  %1902 = vmatpush3.bf16.msra.mxu1 %v2210_v4 }
  0xc1   :  { %1903 = vmatprep.subr.bf16.mxu1 %v2211_v18 }
  0xc3   :  { %1882 = vmatpush3.bf16.msra.mxu0 %v2196_v9 }
  0xc4   :  { %1883 = vmatprep.subr.bf16.mxu0 %v2197_v10  ;;  %1904 = vmatpush3.bf16.msra.mxu1 %v2212_v20 }
  0xc5   :  { %1905 = vmatprep.subr.bf16.mxu1 %v2213_v21 }
  0xc7   :  { %1884 = vmatpush3.bf16.msra.mxu0 %v2198_v11 }
  0xc8   :  { %1885 = vmatprep.subr.bf16.mxu0 %v2199_v12  ;;  %1906 = vmatpush3.bf16.msra.mxu1 %v2214_v24 }
  0xc9   :  { %1907 = vmatprep.subr.bf16.mxu1 %v2215_v25 }
  0xcb   :  { %1886 = vmatpush3.bf16.msra.mxu0 %v2200_v13 }
  0xcc   :  { %1887 = vmatprep.subr.bf16.mxu0 %v2201_v14  ;;  %1908 = vmatpush3.bf16.msra.mxu1 %v2216_v27  ;;  %v2225_v27 = vld [vmem:[#allocation8 + $0x38] sm:$0xff]  }
  0xcd   :  { %1909 = vmatprep.subr.bf16.mxu1 %v2217_v28  ;;  %v2378_v28 = vmov 0.0  }
  0xcf   :  { %1888 = vmatpush3.bf16.msra.mxu0 %v2202_v15 }
  0xd0   :  { %1889 = vmatprep.subr.bf16.mxu0 %v2203_v16  ;;  %1910 = vmatpush3.bf16.msra.mxu1 %v2218_v29  ;;  %v2226_v29 = vld [vmem:[#allocation8 + $0x30] sm:$0xff]  }
  0xd1   :  { %1911 = vmatprep.subr.bf16.mxu1 %v2219_v30  ;;  %v2227_v30 = vld [vmem:[#allocation8 + $0x28] sm:$0xff]  }
  0xd3   :  { %1890 = vmatpush3.bf16.msra.mxu0 %v2204_v5 }
  0xd4   :  { %1891 = vmatprep.subr.bf16.mxu0 %v2205_v19  ;;  %1912 = vmatpush3.bf16.msra.mxu1 %v2220_v31  ;;  %v2228_v31 = vld [vmem:[#allocation8 + $0x20] sm:$0xff]  }
  0xd5   :  { %1913 = vmatprep.subr.bf16.mxu1 %v2221_v32  ;;  %v2229_v32 = vld [vmem:[#allocation8 + $0x18] sm:$0xff]  }
  0xd7   :  { %1892 = vmatpush3.bf16.msra.mxu0 %v2206_v22 }
  0xd8   :  { %1893 = vmatprep.subr.bf16.mxu0 %v2207_v23  ;;  %1914 = vmatpush3.bf16.msra.mxu1 %v2222_v33  ;;  %v2230_v33 = vld [vmem:[#allocation8 + $0x10] sm:$0xff]  }
  0xd9   :  { %1915 = vmatprep.subr.bf16.mxu1 %v2223_v34  ;;  %v2231_v34 = vld [vmem:[#allocation8 + $0x8] sm:$0xff]  }
  0xdb   :  { %1894 = vmatpush3.bf16.msra.mxu0 %v2208_v26 }
  0xdc   :  { %1916 = vmatpush3.bf16.msra.mxu1 %v2224_v35  ;;  %1941 = vmatprep.subr.bf16.mxu0 %v2378_v28  ;;  %v2232_v35 = vld [vmem:[#allocation8] sm:$0xff]  }
  0xdd   :  { %1961 = vmatprep.subr.bf16.mxu1 %v2378_v28 }
 0x13e   :  { %v950_v43 = vpop.f32.mrf.mxu0 }
 0x13f   :  { %v993_v44 = vpop.f32.mrf.mxu1  ;;  %v951_v48 = vadd.f32 %v950_v43, %v239_v42 }
 0x140   :  { %v952_v45 = vpop.f32.mrf.mxu0 }
 0x141   :  { %v995_v46 = vpop.f32.mrf.mxu1  ;;  %v953_v47 = vadd.f32 %v952_v45, %v243_v41  ;;  %v994_v56 = vadd.f32 %v993_v44, %v951_v48 }
 0x142   :  { %v954_v49 = vpop.f32.mrf.mxu0 }
 0x143   :  { %v997_v50 = vpop.f32.mrf.mxu1  ;;  %v955_v51 = vadd.f32 %v954_v49, %v239_v42  ;;  %v996_v53 = vadd.f32 %v995_v46, %v953_v47  ;;  %v1088_v62 = vmax.f32 %v994_v56, 0.0  ;;  %v1828_v47 = vld [vmem:[%s2504_s6] ss:$0 sm:$0xff] }
 0x144   :  { %v956_v52 = vpop.f32.mrf.mxu0 }
 0x145   :  { %v998_v54 = vadd.f32 %v997_v50, %v955_v51  ;;  %v957_v55 = vadd.f32 %v956_v52, %v243_v41  ;;  %v999_v57 = vpop.f32.mrf.mxu1  ;;  %v1089_v60 = vmax.f32 %v996_v53, 0.0 }
 0x147   :  { %v1000_v58 = vadd.f32 %v999_v57, %v957_v55  ;;  %v1092_v59 = vmax.f32 %v998_v54, 0.0 }
 0x149   :  { %v1093_v61 = vmax.f32 %v1000_v58, 0.0  ;;  %v1096_v0 = vpack.c.bf16 %v1092_v59, %v1088_v62  ;;  %v2239_v62 = vld [vmem:[#allocation10 + $0x8] sm:$0xff]  }
 0x14b   :  { %v1097_v63 = vpack.c.bf16 %v1093_v61, %v1089_v60  ;;  %v2238_v61 = vld [vmem:[#allocation10 + $0x10] sm:$0xff]  }
 0x14d   :  { %1395 = vmatprep.mubr.bf16.mxu0 %v1097_v63  ;;  %v2240_v63 = vld [vmem:[#allocation10] sm:$0xff]  }
 0x14e   :  { %1396 = vmatmul.mubr.bf16.vlgmr.msra.gmra.mxu0 %v1096_v0  ;;  %v1861_v0 = vld [vmem:[%s2505_s7] ss:$0 sm:$0xff]  ;;  %s2341_s7 = scalar_lea.vmem %s1683_s19, 256 }
 0x14f   :  { %1942 = vmatpush3.bf16.msra.mxu0 %v2225_v27  ;;  %1957 = vmatprep.mubr.msk.bf16.mxu0 %vm2379_vm0, %v2378_v28  ;;  %p2342_p11 = scmp.ne.s32.totalorder %s1683_s19, %s2341_s7  ;;  %p2347_p13 = scmp.lt.s32.totalorder %s2341_s7, %s2341_s7 }
 0x150   :  { %1943 = vmatprep.subr.bf16.mxu0 %v2378_v28 }
 0x151   :  { %p2348_p0 = por %p2347_p13, %p2346_p12 }
 0x153   :  { %1944 = vmatpush3.bf16.msra.mxu0 %v2226_v29  ;;  %p2349_p1 = pnand %p2348_p0, %p2342_p11 }
 0x154   :  { %1945 = vmatprep.subr.bf16.mxu0 %v2378_v28 }
 0x157   :  { %1946 = vmatpush3.bf16.msra.mxu0 %v2227_v30 }
 0x158   :  { %1947 = vmatprep.subr.bf16.mxu0 %v2378_v28 }
 0x15b   :  { %1948 = vmatpush3.bf16.msra.mxu0 %v2228_v31 }
 0x15c   :  { %1949 = vmatprep.subr.bf16.mxu0 %v2378_v28 }
 0x15f   :  { %1950 = vmatpush3.bf16.msra.mxu0 %v2229_v32 }
 0x160   :  { %1951 = vmatprep.subr.bf16.mxu0 %v2378_v28 }
 0x163   :  { %1952 = vmatpush3.bf16.msra.mxu0 %v2230_v33 }
 0x164   :  { %1953 = vmatprep.subr.bf16.mxu0 %v2378_v28 }
 0x167   :  { %1954 = vmatpush3.bf16.msra.mxu0 %v2231_v34 }
 0x168   :  { %1955 = vmatprep.subr.bf16.mxu0 %v2378_v28 }
 0x16b   :  { %1956 = vmatpush3.bf16.msra.mxu0 %v2232_v35 }
 0x17e   :  { %v1036_v7 = vpop.f32.mrf.mxu0 }
 0x17f   :  { %v1079_v8 = vpop.f32.mrf.mxu1  ;;  %v1037_v12 = vadd.f32 %v1036_v7, %v247_v6 }
 0x180   :  { %v1038_v9 = vpop.f32.mrf.mxu0 }
 0x181   :  { %v1081_v10 = vpop.f32.mrf.mxu1  ;;  %v1039_v11 = vadd.f32 %v1038_v9, %v251_v3  ;;  %v1080_v5 = vadd.f32 %v1079_v8, %v1037_v12  ;;  %v1870_v12 = vld [vmem:[%s2506_s8] ss:$0 sm:$0xff] }
 0x182   :  { %v1040_v13 = vpop.f32.mrf.mxu0 }
 0x183   :  { %v1083_v14 = vpop.f32.mrf.mxu1  ;;  %v1041_v15 = vadd.f32 %v1040_v13, %v247_v6  ;;  %v1082_v17 = vadd.f32 %v1081_v10, %v1039_v11  ;;  %v1090_v24 = vmax.f32 %v1080_v5, 0.0 }
 0x184   :  { %v1042_v16 = vpop.f32.mrf.mxu0 }
 0x185   :  { %v1084_v4 = vadd.f32 %v1083_v14, %v1041_v15  ;;  %v1043_v18 = vadd.f32 %v1042_v16, %v251_v3  ;;  %v1085_v19 = vpop.f32.mrf.mxu1  ;;  %v1091_v22 = vmax.f32 %v1082_v17, 0.0 }
 0x187   :  { %v1086_v20 = vadd.f32 %v1085_v19, %v1043_v18  ;;  %v1094_v21 = vmax.f32 %v1084_v4, 0.0 }
 0x189   :  { %v1095_v23 = vmax.f32 %v1086_v20, 0.0  ;;  %v1098_v26 = vpack.c.bf16 %v1094_v21, %v1090_v24 }
 0x18b   :  { %v1099_v25 = vpack.c.bf16 %v1095_v23, %v1091_v22 }
 0x18d   :  { %1436 = vmatprep.mubr.bf16.mxu1 %v1099_v25 }
 0x18e   :  { %1437 = vmatmul.mubr.bf16.vlgmr.msra.gmra.mxu1 %v1098_v26 }
 0x18f   :  { %1977 = vmatprep.mubr.msk.bf16.mxu1 %vm2379_vm0, %v2378_v28  ;;  %1962 = vmatpush3.bf16.msra.mxu1 %v2233_v36 }
 0x190   :  { %1963 = vmatprep.subr.bf16.mxu1 %v2378_v28 }
 0x193   :  { %1964 = vmatpush3.bf16.msra.mxu1 %v2234_v37 }
 0x194   :  { %1965 = vmatprep.subr.bf16.mxu1 %v2378_v28 }
 0x197   :  { %1966 = vmatpush3.bf16.msra.mxu1 %v2235_v38 }
 0x198   :  { %1967 = vmatprep.subr.bf16.mxu1 %v2378_v28 }
 0x19b   :  { %1968 = vmatpush3.bf16.msra.mxu1 %v2236_v39 }
 0x19c   :  { %1969 = vmatprep.subr.bf16.mxu1 %v2378_v28 }
 0x19f   :  { %1970 = vmatpush3.bf16.msra.mxu1 %v2237_v40 }
 0x1a0   :  { %1971 = vmatprep.subr.bf16.mxu1 %v2378_v28 }
 0x1a3   :  { %1972 = vmatpush3.bf16.msra.mxu1 %v2238_v61 }
 0x1a4   :  { %1973 = vmatprep.subr.bf16.mxu1 %v2378_v28 }
 0x1a7   :  { %1974 = vmatpush3.bf16.msra.mxu1 %v2239_v62 }
 0x1a8   :  { %1975 = vmatprep.subr.bf16.mxu1 %v2378_v28 }
 0x1ab   :  { %1976 = vmatpush3.bf16.msra.mxu1 %v2240_v63 }
 0x20e   :  { %v1895_v41 = vpop.f32.mrf.mxu0 }
 0x210   :  { %v1896_v42 = vpop.f32.mrf.mxu0 }
 0x211   :  { %v1897_v46 = vadd.f32 %v1896_v42, %v1895_v41 }
 0x212   :  { %v1898_v43 = vpop.f32.mrf.mxu0 }
 0x213   :  { %v1398_v52 = vadd.f32 %v1897_v46, %v1828_v47 }
 0x214   :  { %v1899_v44 = vpop.f32.mrf.mxu0 }
 0x215   :  { %v1900_v49 = vadd.f32 %v1899_v44, %v1898_v43 }
 0x217   :  { %v1401_v54 = vadd.f32 %v1900_v49, %v1828_v47 }
 0x24e   :  { %v1917_v45 = vpop.f32.mrf.mxu1 }
 0x250   :  { %v1918_v48 = vpop.f32.mrf.mxu1 }
 0x251   :  { %v1919_v50 = vadd.f32 %v1918_v48, %v1917_v45 }
 0x252   :  { %v1920_v51 = vpop.f32.mrf.mxu1 }
 0x253   :  { %v1439_v55 = vadd.f32 %v1919_v50, %v1398_v52 }
 0x254   :  { %v1921_v53 = vpop.f32.mrf.mxu1 }
 0x255   :  { %v1922_v56 = vadd.f32 %v1921_v53, %v1920_v51  ;;  %v1445_v58 = vmax.f32 %v1439_v55, 0.0 }
 0x257   :  { %v1442_v57 = vadd.f32 %v1922_v56, %v1401_v54 }
 0x259   :  { %v1446_v59 = vmax.f32 %v1442_v57, 0.0 }
 0x25b   :  { %v1447_v60 = vpack.c.bf16 %v1446_v59, %v1445_v58 }
 0x25d   :  { %1958 = vmatmul.mubr.bf16.vlgmr.msra.gmra.mxu0 %v1447_v60 }
 0x31d   :  { %v1553_v1 = vpop.f32.mrf.mxu0 }
 0x31e   :  { %v1554_v3 = vadd.f32 %v1861_v0, %v1553_v1 }
 0x31f   :  { %v1959_v2 = vpop.f32.mrf.mxu0 }
 0x320   :  { %v1560_v9 = vmax.f32 %v1554_v3, 0.0 }
 0x321   :  { %v1556_v6 = vpop.f32.mrf.mxu0 }
 0x322   :  { %v1557_v7 = vadd.f32 %v1861_v0, %v1556_v6 }
 0x323   :  { %v1960_v8 = vpop.f32.mrf.mxu0 }
 0x324   :  { %v1561_v10 = vmax.f32 %v1557_v7, 0.0 }
 0x326   :  { %v1562_v11 = vpack.c.bf16 %v1561_v10, %v1560_v9 }
 0x328   :  { %1978 = vmatmul.mubr.bf16.vlgmr.msra.gmra.mxu1 %v1562_v11 }
 0x3e8   :  { %v1668_v13 = vpop.f32.mrf.mxu1 }
 0x3e9   :  { %v1669_v14 = vadd.f32 %v1870_v12, %v1668_v13 }
 0x3ea   :  { %v1979_v15 = vpop.f32.mrf.mxu1 }
 0x3eb   :  { %1675 = vst [vmem:[#allocation11] sm:$0xff] %v1669_v14 }
 0x3ec   :  { %v1671_v16 = vpop.f32.mrf.mxu1 }
 0x3ed   :  { %v1672_v17 = vadd.f32 %v1870_v12, %v1671_v16 }
 0x3ee   :  { %v1980_v4 = vpop.f32.mrf.mxu1 }
 0x3ef   :  { %1676 = vst [vmem:[#allocation11 + $0x8] sm:$0xff] %v1672_v17 }
 0x3f0   :  { %2352 = shalt.err (!%p2349_p1)
}
 0x3f1   :  { %s2381_s20 = smov 128   ;;  %s2382_s8 = smov 8  }
 0x3f2   :  { %1688 = dma.vmem_to_hbm [thread:$0]  %s1683_s19, 256, %s2507_s9, [#allocation4], %s2381_s20, %s2381_s20, %s2382_s8  }
 0x3f3   :  { %2367 = dma.done.wait [#allocation4], 256  }
 0x3f4   :  { %2368 = vsyncadd [#allocation4], 4294967040 }
 0x3f5   :  { %1692 = vsyncpa [#allocation3], 1 }
 0x3f6   :  { %1693 = vsyncpa [#allocation6], 1 }
 0x3f7   :  { %1694 = vsyncpa [#allocation9], 1 }
 0x3f8   :  { %1695 = vsyncpa [#allocation4], 1 }

</bundles_post_ra>
